<compile_context>
chip_gen: v5e
topology: v5e:2x2
jax: 0.10.0
libtpu: 0.0.40
codegen_flags: <defaults>
</compile_context>

<pallas_src>
import math

import jax
import jax.numpy as jnp
from jax.experimental import pallas as pl
from jax.experimental.pallas import tpu as pltpu


def _round_up(x: int, m: int) -> int:
    return ((x + m - 1) // m) * m


# --------------------------------------------------------------------------- kernels
def conv_stats_kernel(p_ref, w_ref, b_ref, y_ref, s1_ref, s2_ref):
    """Training path: conv tile + in-kernel per-channel sum / sum-of-squares.

    p_ref : (1, K, T)    bf16 im2col patches (K = Cin*9, T = spatial lane tile)
    w_ref : (Cout, K)    bf16 flattened conv weight              (grid-invariant)
    b_ref : (Cout, 1)    f32  conv bias                          (grid-invariant)
    y_ref : (1, Cout, T) bf16 conv output (+bias), lane-dense spatial axis
    s1/s2 : (1, Cout, 1) f32  channel sums of the raw conv (no bias) and its square,
                              accumulated over the spatial grid axis. Padded spatial
                              columns hold W @ 0 == 0, so they add nothing.
    """
    t = pl.program_id(1)
    yraw = jnp.dot(w_ref[...], p_ref[0], preferred_element_type=jnp.float32)

    @pl.when(t == 0)
    def _():
        s1_ref[...] = jnp.zeros_like(s1_ref)
        s2_ref[...] = jnp.zeros_like(s2_ref)

    s1_ref[0] += jnp.sum(yraw, axis=-1, keepdims=True)
    s2_ref[0] += jnp.sum(yraw * yraw, axis=-1, keepdims=True)
    y_ref[0] = (yraw + b_ref[...]).astype(y_ref.dtype)


def conv_affine_kernel(p_ref, w_ref, scale_ref, shift_ref, o_ref):
    """Eval path: conv with BatchNorm folded into a per-channel scale/shift (fp32)."""
    yraw = jnp.dot(w_ref[...], p_ref[0], preferred_element_type=jnp.float32)
    o_ref[0] = (yraw * scale_ref[...] + shift_ref[...]).astype(o_ref.dtype)


def bn_affine_kernel(y_ref, scale_ref, shift_ref, o_ref):
    """Training path pass 2: normalize + affine with per-channel scale/shift (fp32 VPU)."""
    o_ref[0] = (y_ref[0].astype(jnp.float32) * scale_ref[...]
                + shift_ref[...]).astype(o_ref.dtype)


# --------------------------------------------------------------------------- sizing
def _vmem_budget_bytes() -> int:
    try:
        info = pltpu.get_tpu_info()
        cap = int(getattr(info, "vmem_capacity_bytes", 128 * 1024 * 1024))
    except Exception:
        cap = 128 * 1024 * 1024
    # v7x: 64 MiB per TensorCore -> cap the scoped limit at 40 MiB (headroom for compiler
    # scratch); v5e/v6e: 128 MiB physical -> allow 96 MiB to enable bigger lane tiles.
    return (40 << 20) if cap <= (64 << 20) else (96 << 20)


def _pick_lane_tile(lane_tile, hwo, K, Cout, n_batch, vmem_limit):
    t = min(_round_up(max(lane_tile, 128), 128), _round_up(hwo, 128))

    def footprint(tt):
        # double-buffered patches (bf16) + double-buffered bf16 out + fp32 matmul result
        # + single-buffered weight
        return 2 * K * tt * 2 + 2 * Cout * tt * 2 + Cout * tt * 4 + Cout * K * 2

    budget = vmem_limit // 2        # leave room for compiler scratch / 2nd-pass buffers
    while t > 128 and footprint(t) > budget:
        t -= 128
    # Guarantee >=2 parallel grid units so both v7x TensorCores get work.
    if n_batch == 1 and hwo > 128:
        t = min(t, _round_up((hwo + 1) // 2, 128))
    return t


# --------------------------------------------------------------------------- forward
def middle_embedding_forward(x, w, b, gamma, beta, *, eps=1e-5,
                             running_mean=None, running_var=None,
                             lane_tile=2048, mxu_dtype=jnp.bfloat16,
                             out_dtype=jnp.float32):
    """x: (N, Cin, H, W). w: (Cout, Cin, 3, 3). b/gamma/beta: (Cout,).
    Returns (N, Cout, Ho, Wo), Ho = floor((H-1)/2)+1 (stride 2, pad 1, k 3)."""
    N, Cin, H, W = x.shape
    Cout = w.shape[0]
    Ho = (H + 2 - 3) // 2 + 1
    Wo = (W + 2 - 3) // 2 + 1
    K = Cin * 9
    HWo = Ho * Wo

    vmem_limit = _vmem_budget_bytes()
    t_hw = _pick_lane_tile(lane_tile, HWo, K, Cout, N, vmem_limit)
    hwo_pad = _round_up(HWo, t_hw)
    grid = (N, hwo_pad // t_hw)

    # im2col in the wrapper (built directly in bf16 so XLA moves half the bytes).
    # TODO(synk): in-kernel im2col via manual halo DMA would remove this HBM stream.
    x_pad = jnp.pad(x.astype(mxu_dtype), ((0, 0), (0, 0), (1, 1), (1, 1)))
    taps = [x_pad[:, :, kh:kh + 2 * Ho - 1:2, kw:kw + 2 * Wo - 1:2]
            for kh in range(3) for kw in range(3)]
    patches = jnp.stack(taps, axis=2).reshape(N, K, HWo)          # (N, Cin*9, Ho*Wo)
    if hwo_pad != HWo:
        patches = jnp.pad(patches, ((0, 0), (0, 0), (0, hwo_pad - HWo)))

    w_flat = w.reshape(Cout, K).astype(mxu_dtype)   # (cin, kh, kw) ordering matches taps
    b32 = b.astype(jnp.float32)
    g32 = gamma.astype(jnp.float32)
    bt32 = beta.astype(jnp.float32)

    def const_spec(shape, single_buffer):
        if single_buffer:
            return pl.BlockSpec(shape, lambda n, t: (0, 0), pipeline_mode=pl.Buffered(1))
        return pl.BlockSpec(shape, lambda n, t: (0, 0))

    def cparams(spatial_sem):
        return pltpu.CompilerParams(
            dimension_semantics=("parallel", spatial_sem),
            vmem_limit_bytes=vmem_limit)

    # ---------------------------------------------------------------- eval path
    if running_mean is not None and running_var is not None:
        inv = jax.lax.rsqrt(running_var.astype(jnp.float32) + eps)
        scale = (g32 * inv).reshape(Cout, 1)
        shift = (scale[:, 0] * (b32 - running_mean.astype(jnp.float32)) + bt32
                 ).reshape(Cout, 1)

        def run_eval(single_buffer):
            return pl.pallas_call(
                conv_affine_kernel,
                out_shape=jax.ShapeDtypeStruct((N, Cout, hwo_pad), out_dtype),
                grid=grid,
                in_specs=[
                    pl.BlockSpec((1, K, t_hw), lambda n, t: (n, 0, t)),
                    const_spec((Cout, K), single_buffer),
                    const_spec((Cout, 1), single_buffer),
                    const_spec((Cout, 1), single_buffer),
                ],
                out_specs=pl.BlockSpec((1, Cout, t_hw), lambda n, t: (n, 0, t)),
                compiler_params=cparams("parallel"),
            )(patches, w_flat, scale, shift)

        try:
            out = run_eval(True)
        except Exception:           # fallback if Buffered(1) is rejected by this build
            out = run_eval(False)
        return out[:, :, :HWo].reshape(N, Cout, Ho, Wo)

    # ---------------------------------------------------------------- training path
    def run_conv(single_buffer):
        return pl.pallas_call(
            conv_stats_kernel,
            out_shape=(
                jax.ShapeDtypeStruct((N, Cout, hwo_pad), jnp.bfloat16),   # bf16 intermediate
                jax.ShapeDtypeStruct((N, Cout, 1), jnp.float32),          # sum
                jax.ShapeDtypeStruct((N, Cout, 1), jnp.float32),          # sum of squares
            ),
            grid=grid,
            in_specs=[
                pl.BlockSpec((1, K, t_hw), lambda n, t: (n, 0, t)),
                const_spec((Cout, K), single_buffer),
                const_spec((Cout, 1), single_buffer),
            ],
            out_specs=(
                pl.BlockSpec((1, Cout, t_hw), lambda n, t: (n, 0, t)),
                pl.BlockSpec((1, Cout, 1), lambda n, t: (n, 0, 0)),   # spatial accumulator
                pl.BlockSpec((1, Cout, 1), lambda n, t: (n, 0, 0)),   # spatial accumulator
            ),
            compiler_params=cparams("arbitrary"),   # accumulators over the spatial axis
        )(patches, w_flat, b32.reshape(Cout, 1))

    try:
        yconv, s1, s2 = run_conv(True)
    except Exception:               # fallback if Buffered(1) is rejected by this build
        yconv, s1, s2 = run_conv(False)

    # Finalize batch statistics (tiny (N, Cout) reduction; biased var, as PyTorch uses
    # for normalization in training-mode forward). Bias cancels in the variance.
    cnt = float(N * HWo)
    s1_tot = jnp.sum(s1[:, :, 0], axis=0)
    s2_tot = jnp.sum(s2[:, :, 0], axis=0)
    mean_raw = s1_tot / cnt
    var = s2_tot / cnt - mean_raw * mean_raw
    mean = mean_raw + b32
    inv = jax.lax.rsqrt(var + eps)
    scale = (g32 * inv).reshape(Cout, 1)
    shift = (bt32 - g32 * inv * mean).reshape(Cout, 1)

    def run_bn(single_buffer):
        return pl.pallas_call(
            bn_affine_kernel,
            out_shape=jax.ShapeDtypeStruct((N, Cout, hwo_pad), out_dtype),
            grid=grid,
            in_specs=[
                pl.BlockSpec((1, Cout, t_hw), lambda n, t: (n, 0, t)),
                const_spec((Cout, 1), single_buffer),
                const_spec((Cout, 1), single_buffer),
            ],
            out_specs=pl.BlockSpec((1, Cout, t_hw), lambda n, t: (n, 0, t)),
            compiler_params=cparams("parallel"),
        )(yconv, scale, shift)

    try:
        out = run_bn(True)
    except Exception:
        out = run_bn(False)

    return out[:, :, :HWo].reshape(N, Cout, Ho, Wo)


# --------------------------------------------------------------------------- self-test
if __name__ == "__main__":
    key = jax.random.PRNGKey(0)
    kx, kw, kb, kg, kbt, km, kv = jax.random.split(key, 7)

    N, Cin, H, W = 2, 4, 16, 16
    Cout = 8
    eps = 1e-5

    x = jax.random.normal(kx, (N, Cin, H, W), jnp.float32)
    fan_in = Cin * 9
    bound = 1.0 / math.sqrt(fan_in)            # torch Conv2d default init bound
    w = jax.random.uniform(kw, (Cout, Cin, 3, 3), jnp.float32, -bound, bound)
    b = jax.random.uniform(kb, (Cout,), jnp.float32, -bound, bound)
    gamma = 1.0 + 0.1 * jax.random.normal(kg, (Cout,), jnp.float32)
    beta = 0.1 * jax.random.normal(kbt, (Cout,), jnp.float32)
    run_mean = 0.1 * jax.random.normal(km, (Cout,), jnp.float32)
    run_var = jax.random.uniform(kv, (Cout,), jnp.float32, 0.5, 1.5)

    Ho, Wo = (H + 2 - 3) // 2 + 1, (W + 2 - 3) // 2 + 1

    # ---- training-mode forward (PyTorch default: batch stats, biased variance) ----
    out_train = jax.block_until_ready(
        middle_embedding_forward(x, w, b, gamma, beta, eps=eps))

    # Reference mirrors the kernel pipeline: bf16 conv operands with fp32 accumulation,
    # fp32 batch stats, bf16-rounded conv intermediate, fp32 normalize + affine.
    xq = x.astype(jnp.bfloat16).astype(jnp.float32)
    wq = w.astype(jnp.bfloat16).astype(jnp.float32)
    conv = jax.lax.conv_general_dilated(
        xq, wq, window_strides=(2, 2), padding=((1, 1), (1, 1)),
        dimension_numbers=("NCHW", "OIHW", "NCHW"),
        precision=jax.lax.Precision.HIGHEST) + b[None, :, None, None]
    mu = conv.mean(axis=(0, 2, 3), keepdims=True)
    va = conv.var(axis=(0, 2, 3), keepdims=True)      # biased, as PyTorch normalizes with
    conv_bf16 = conv.astype(jnp.bfloat16).astype(jnp.float32)
    ref_train = (conv_bf16 - mu) * jax.lax.rsqrt(va + eps)
    ref_train = ref_train * gamma[None, :, None, None] + beta[None, :, None, None]

    assert out_train.shape == (N, Cout, Ho, Wo), out_train.shape
    err = jnp.abs(out_train - ref_train)
    # max error bounded by ~1 bf16 ulp of the activation scale (bf16 intermediate store)
    assert float(jnp.max(err)) < 3e-2, float(jnp.max(err))
    assert float(jnp.mean(err)) < 5e-3, float(jnp.mean(err))

    # ---- eval-mode forward (running stats; BN fused into the conv kernel) ----
    out_eval = jax.block_until_ready(
        middle_embedding_forward(x, w, b, gamma, beta, eps=eps,
                                 running_mean=run_mean, running_var=run_var))
    ref_eval = (conv - run_mean[None, :, None, None]) \
        * jax.lax.rsqrt(run_var[None, :, None, None] + eps)
    ref_eval = ref_eval * gamma[None, :, None, None] + beta[None, :, None, None]
    assert out_eval.shape == (N, Cout, Ho, Wo)
    assert float(jnp.max(jnp.abs(out_eval - ref_eval))) < 2e-3, \
        float(jnp.max(jnp.abs(out_eval - ref_eval)))

    print("KERNEL_OK")
</pallas_src>

<mosaic_0001>
module attributes {stable_mosaic.version = 11 : i64} {
  func.func @conv_stats_kernel(%arg0: i32, %arg1: i32, %arg2: memref<1x36x128xbf16, #tpu.memory_space<vmem>>, %arg3: memref<8x36xbf16, #tpu.memory_space<vmem>>, %arg4: memref<8x1xf32, #tpu.memory_space<vmem>>, %arg5: memref<1x8x128xbf16, #tpu.memory_space<vmem>>, %arg6: memref<1x8x1xf32, #tpu.memory_space<vmem>>, %arg7: memref<1x8x1xf32, #tpu.memory_space<vmem>>) attributes {dimension_semantics = [#tpu.dimension_semantics<parallel>, #tpu.dimension_semantics<arbitrary>], iteration_bounds = array<i64: 2, 1>, scalar_prefetch = 0 : i64, scratch_operands = 0 : i64, tpu.core_type = #tpu.core_type<tc>, window_params = [{transform_indices = @transform_0, window_bounds = array<i64: 1, 36, 128>}, {pipeline_mode = #tpu.pipeline_mode<synchronous>, transform_indices = @transform_1, window_bounds = array<i64: 8, 36>}, {pipeline_mode = #tpu.pipeline_mode<synchronous>, transform_indices = @transform_2, window_bounds = array<i64: 8, 1>}, {transform_indices = @transform_3, window_bounds = array<i64: 1, 8, 128>}, {transform_indices = @transform_4, window_bounds = array<i64: 1, 8, 1>}, {transform_indices = @transform_5, window_bounds = array<i64: 1, 8, 1>}]} {
    %c0 = arith.constant 0 : index
    %c0_0 = arith.constant 0 : index
    %0 = vector.load %arg3[%c0, %c0_0] : memref<8x36xbf16, #tpu.memory_space<vmem>>, vector<8x36xbf16>
    %c0_1 = arith.constant 0 : index
    %c0_2 = arith.constant 0 : index
    %c0_3 = arith.constant 0 : index
    %1 = vector.load %arg2[%c0_1, %c0_2, %c0_3] : memref<1x36x128xbf16, #tpu.memory_space<vmem>>, vector<1x36x128xbf16>
    %2 = vector.shape_cast %1 : vector<1x36x128xbf16> to vector<36x128xbf16>
    %cst = arith.constant dense<0.000000e+00> : vector<8x128xf32>
    %3 = tpu.matmul %0, %2, %cst {dimension_numbers = #tpu.dot_dimension_numbers<[1], [0], [0], [1], [0, 0, 1, 1], [], []>} : vector<8x36xbf16>, vector<36x128xbf16>, vector<8x128xf32> -> vector<8x128xf32>
    %c0_i32 = arith.constant 0 : i32
    %4 = arith.cmpi eq, %arg1, %c0_i32 : i32
    %5 = arith.extui %4 : i1 to i32
    %c0_i32_4 = arith.constant 0 : i32
    %6 = arith.cmpi ne, %5, %c0_i32_4 : i32
    scf.if %6 {
      %cst_24 = arith.constant 0.000000e+00 : f32
      %31 = vector.broadcast %cst_24 : f32 to vector<1x8x1xf32>
      %c0_25 = arith.constant 0 : index
      %c0_26 = arith.constant 0 : index
      %c0_27 = arith.constant 0 : index
      %32 = vector.load %arg6[%c0_25, %c0_26, %c0_27] : memref<1x8x1xf32, #tpu.memory_space<vmem>>, vector<1x8x1xf32>
      tpu.vector_store %arg6[%c0_25, %c0_26, %c0_27], %31 {strides = array<i32>} : memref<1x8x1xf32, #tpu.memory_space<vmem>>, vector<1x8x1xf32>,
      %cst_28 = arith.constant 0.000000e+00 : f32
      %33 = vector.broadcast %cst_28 : f32 to vector<1x8x1xf32>
      %c0_29 = arith.constant 0 : index
      %c0_30 = arith.constant 0 : index
      %c0_31 = arith.constant 0 : index
      %34 = vector.load %arg7[%c0_29, %c0_30, %c0_31] : memref<1x8x1xf32, #tpu.memory_space<vmem>>, vector<1x8x1xf32>
      tpu.vector_store %arg7[%c0_29, %c0_30, %c0_31], %33 {strides = array<i32>} : memref<1x8x1xf32, #tpu.memory_space<vmem>>, vector<1x8x1xf32>,
    } else {
    }
    %c0_5 = arith.constant 0 : index
    %c0_6 = arith.constant 0 : index
    %c0_7 = arith.constant 0 : index
    %7 = vector.load %arg6[%c0_5, %c0_6, %c0_7] : memref<1x8x1xf32, #tpu.memory_space<vmem>>, vector<1x8x1xf32>
    %8 = vector.shape_cast %7 : vector<1x8x1xf32> to vector<8x1xf32>
    %cst_8 = arith.constant dense<0.000000e+00> : vector<8xf32>
    %9 = vector.multi_reduction <add>, %3, %cst_8 [1] : vector<8x128xf32> to vector<8xf32>
    %10 = vector.shape_cast %9 : vector<8xf32> to vector<8x1xf32>
    %11 = arith.addf %8, %10 : vector<8x1xf32>
    %c0_9 = arith.constant 0 : index
    %c0_10 = arith.constant 0 : index
    %c0_11 = arith.constant 0 : index
    %12 = vector.load %arg6[%c0_9, %c0_10, %c0_11] : memref<1x8x1xf32, #tpu.memory_space<vmem>>, vector<1x8x1xf32>
    %13 = vector.shape_cast %12 : vector<1x8x1xf32> to vector<8x1xf32>
    %14 = vector.shape_cast %11 : vector<8x1xf32> to vector<1x8x1xf32>
    tpu.vector_store %arg6[%c0_9, %c0_10, %c0_11], %14 {strides = array<i32>} : memref<1x8x1xf32, #tpu.memory_space<vmem>>, vector<1x8x1xf32>,
    %c0_12 = arith.constant 0 : index
    %c0_13 = arith.constant 0 : index
    %c0_14 = arith.constant 0 : index
    %15 = vector.load %arg7[%c0_12, %c0_13, %c0_14] : memref<1x8x1xf32, #tpu.memory_space<vmem>>, vector<1x8x1xf32>
    %16 = vector.shape_cast %15 : vector<1x8x1xf32> to vector<8x1xf32>
    %17 = arith.mulf %3, %3 : vector<8x128xf32>
    %cst_15 = arith.constant dense<0.000000e+00> : vector<8xf32>
    %18 = vector.multi_reduction <add>, %17, %cst_15 [1] : vector<8x128xf32> to vector<8xf32>
    %19 = vector.shape_cast %18 : vector<8xf32> to vector<8x1xf32>
    %20 = arith.addf %16, %19 : vector<8x1xf32>
    %c0_16 = arith.constant 0 : index
    %c0_17 = arith.constant 0 : index
    %c0_18 = arith.constant 0 : index
    %21 = vector.load %arg7[%c0_16, %c0_17, %c0_18] : memref<1x8x1xf32, #tpu.memory_space<vmem>>, vector<1x8x1xf32>
    %22 = vector.shape_cast %21 : vector<1x8x1xf32> to vector<8x1xf32>
    %23 = vector.shape_cast %20 : vector<8x1xf32> to vector<1x8x1xf32>
    tpu.vector_store %arg7[%c0_16, %c0_17, %c0_18], %23 {strides = array<i32>} : memref<1x8x1xf32, #tpu.memory_space<vmem>>, vector<1x8x1xf32>,
    %c0_19 = arith.constant 0 : index
    %c0_20 = arith.constant 0 : index
    %24 = vector.load %arg4[%c0_19, %c0_20] : memref<8x1xf32, #tpu.memory_space<vmem>>, vector<8x1xf32>
    %25 = vector.broadcast %24 : vector<8x1xf32> to vector<8x128xf32>
    %26 = arith.addf %3, %25 : vector<8x128xf32>
    %27 = arith.truncf %26 : vector<8x128xf32> to vector<8x128xbf16>
    %c0_21 = arith.constant 0 : index
    %c0_22 = arith.constant 0 : index
    %c0_23 = arith.constant 0 : index
    %28 = vector.load %arg5[%c0_21, %c0_22, %c0_23] : memref<1x8x128xbf16, #tpu.memory_space<vmem>>, vector<1x8x128xbf16>
    %29 = vector.shape_cast %28 : vector<1x8x128xbf16> to vector<8x128xbf16>
    %30 = vector.shape_cast %27 : vector<8x128xbf16> to vector<1x8x128xbf16>
    tpu.vector_store %arg5[%c0_21, %c0_22, %c0_23], %30 {strides = array<i32>} : memref<1x8x128xbf16, #tpu.memory_space<vmem>>, vector<1x8x128xbf16>,
    return
  }
  func.func @transform_0(%arg0: i32, %arg1: i32) -> (i32, i32, i32) {
    %c0_i32 = arith.constant 0 : i32
    %c0_i32_0 = arith.constant 0 : i32
    return %arg0, %c0_i32, %arg1 : i32, i32, i32
  }
  func.func @transform_1(%arg0: i32, %arg1: i32) -> (i32, i32) {
    %c0_i32 = arith.constant 0 : i32
    %c0_i32_0 = arith.constant 0 : i32
    %c0_i32_1 = arith.constant 0 : i32
    return %c0_i32, %c0_i32_0 : i32, i32
  }
  func.func @transform_2(%arg0: i32, %arg1: i32) -> (i32, i32) {
    %c0_i32 = arith.constant 0 : i32
    %c0_i32_0 = arith.constant 0 : i32
    %c0_i32_1 = arith.constant 0 : i32
    return %c0_i32, %c0_i32_0 : i32, i32
  }
  func.func @transform_3(%arg0: i32, %arg1: i32) -> (i32, i32, i32) {
    %c0_i32 = arith.constant 0 : i32
    %c0_i32_0 = arith.constant 0 : i32
    return %arg0, %c0_i32, %arg1 : i32, i32, i32
  }
  func.func @transform_4(%arg0: i32, %arg1: i32) -> (i32, i32, i32) {
    %c0_i32 = arith.constant 0 : i32
    %c0_i32_0 = arith.constant 0 : i32
    %c0_i32_1 = arith.constant 0 : i32
    return %arg0, %c0_i32, %c0_i32_0 : i32, i32, i32
  }
  func.func @transform_5(%arg0: i32, %arg1: i32) -> (i32, i32, i32) {
    %c0_i32 = arith.constant 0 : i32
    %c0_i32_0 = arith.constant 0 : i32
    %c0_i32_1 = arith.constant 0 : i32
    return %arg0, %c0_i32, %c0_i32_0 : i32, i32, i32
  }
}

module attributes {stable_mosaic.version = 11 : i64} {
  func.func @conv_stats_kernel(%arg0: i32, %arg1: i32, %arg2: memref<1x36x128xbf16, #tpu.memory_space<vmem>>, %arg3: memref<8x36xbf16, #tpu.memory_space<vmem>>, %arg4: memref<8x1xf32, #tpu.memory_space<vmem>>, %arg5: memref<1x8x128xbf16, #tpu.memory_space<vmem>>, %arg6: memref<1x8x1xf32, #tpu.memory_space<vmem>>, %arg7: memref<1x8x1xf32, #tpu.memory_space<vmem>>) attributes {dimension_semantics = [#tpu.dimension_semantics<parallel>, #tpu.dimension_semantics<arbitrary>], iteration_bounds = array<i64: 2, 1>, scalar_prefetch = 0 : i64, scratch_operands = 0 : i64, tpu.core_type = #tpu.core_type<tc>, window_params = [{transform_indices = @transform_0, window_bounds = array<i64: 1, 36, 128>}, {pipeline_mode = #tpu.pipeline_mode<synchronous>, transform_indices = @transform_1, window_bounds = array<i64: 8, 36>}, {pipeline_mode = #tpu.pipeline_mode<synchronous>, transform_indices = @transform_2, window_bounds = array<i64: 8, 1>}, {transform_indices = @transform_3, window_bounds = array<i64: 1, 8, 128>}, {transform_indices = @transform_4, window_bounds = array<i64: 1, 8, 1>}, {transform_indices = @transform_5, window_bounds = array<i64: 1, 8, 1>}]} {
    %c0 = arith.constant 0 : index
    %c0_0 = arith.constant 0 : index
    %0 = vector.load %arg3[%c0, %c0_0] : memref<8x36xbf16, #tpu.memory_space<vmem>>, vector<8x36xbf16>
    %c0_1 = arith.constant 0 : index
    %c0_2 = arith.constant 0 : index
    %c0_3 = arith.constant 0 : index
    %1 = vector.load %arg2[%c0_1, %c0_2, %c0_3] : memref<1x36x128xbf16, #tpu.memory_space<vmem>>, vector<1x36x128xbf16>
    %2 = vector.shape_cast %1 : vector<1x36x128xbf16> to vector<36x128xbf16>
    %cst = arith.constant dense<0.000000e+00> : vector<8x128xf32>
    %3 = tpu.matmul %0, %2, %cst {dimension_numbers = #tpu.dot_dimension_numbers<[1], [0], [0], [1], [0, 0, 1, 1], [], []>} : vector<8x36xbf16>, vector<36x128xbf16>, vector<8x128xf32> -> vector<8x128xf32>
    %c0_i32 = arith.constant 0 : i32
    %4 = arith.cmpi eq, %arg1, %c0_i32 : i32
    %5 = arith.extui %4 : i1 to i32
    %c0_i32_4 = arith.constant 0 : i32
    %6 = arith.cmpi ne, %5, %c0_i32_4 : i32
    scf.if %6 {
      %cst_24 = arith.constant 0.000000e+00 : f32
      %31 = vector.broadcast %cst_24 : f32 to vector<1x8x1xf32>
      %c0_25 = arith.constant 0 : index
      %c0_26 = arith.constant 0 : index
      %c0_27 = arith.constant 0 : index
      %32 = vector.load %arg6[%c0_25, %c0_26, %c0_27] : memref<1x8x1xf32, #tpu.memory_space<vmem>>, vector<1x8x1xf32>
      tpu.vector_store %arg6[%c0_25, %c0_26, %c0_27], %31 {strides = array<i32>} : memref<1x8x1xf32, #tpu.memory_space<vmem>>, vector<1x8x1xf32>,
      %cst_28 = arith.constant 0.000000e+00 : f32
      %33 = vector.broadcast %cst_28 : f32 to vector<1x8x1xf32>
      %c0_29 = arith.constant 0 : index
      %c0_30 = arith.constant 0 : index
      %c0_31 = arith.constant 0 : index
      %34 = vector.load %arg7[%c0_29, %c0_30, %c0_31] : memref<1x8x1xf32, #tpu.memory_space<vmem>>, vector<1x8x1xf32>
      tpu.vector_store %arg7[%c0_29, %c0_30, %c0_31], %33 {strides = array<i32>} : memref<1x8x1xf32, #tpu.memory_space<vmem>>, vector<1x8x1xf32>,
    } else {
    }
    %c0_5 = arith.constant 0 : index
    %c0_6 = arith.constant 0 : index
    %c0_7 = arith.constant 0 : index
    %7 = vector.load %arg6[%c0_5, %c0_6, %c0_7] : memref<1x8x1xf32, #tpu.memory_space<vmem>>, vector<1x8x1xf32>
    %8 = vector.shape_cast %7 : vector<1x8x1xf32> to vector<8x1xf32>
    %cst_8 = arith.constant dense<0.000000e+00> : vector<8xf32>
    %9 = vector.multi_reduction <add>, %3, %cst_8 [1] : vector<8x128xf32> to vector<8xf32>
    %10 = vector.shape_cast %9 : vector<8xf32> to vector<8x1xf32>
    %11 = arith.addf %8, %10 : vector<8x1xf32>
    %c0_9 = arith.constant 0 : index
    %c0_10 = arith.constant 0 : index
    %c0_11 = arith.constant 0 : index
    %12 = vector.load %arg6[%c0_9, %c0_10, %c0_11] : memref<1x8x1xf32, #tpu.memory_space<vmem>>, vector<1x8x1xf32>
    %13 = vector.shape_cast %12 : vector<1x8x1xf32> to vector<8x1xf32>
    %14 = vector.shape_cast %11 : vector<8x1xf32> to vector<1x8x1xf32>
    tpu.vector_store %arg6[%c0_9, %c0_10, %c0_11], %14 {strides = array<i32>} : memref<1x8x1xf32, #tpu.memory_space<vmem>>, vector<1x8x1xf32>,
    %c0_12 = arith.constant 0 : index
    %c0_13 = arith.constant 0 : index
    %c0_14 = arith.constant 0 : index
    %15 = vector.load %arg7[%c0_12, %c0_13, %c0_14] : memref<1x8x1xf32, #tpu.memory_space<vmem>>, vector<1x8x1xf32>
    %16 = vector.shape_cast %15 : vector<1x8x1xf32> to vector<8x1xf32>
    %17 = arith.mulf %3, %3 : vector<8x128xf32>
    %cst_15 = arith.constant dense<0.000000e+00> : vector<8xf32>
    %18 = vector.multi_reduction <add>, %17, %cst_15 [1] : vector<8x128xf32> to vector<8xf32>
    %19 = vector.shape_cast %18 : vector<8xf32> to vector<8x1xf32>
    %20 = arith.addf %16, %19 : vector<8x1xf32>
    %c0_16 = arith.constant 0 : index
    %c0_17 = arith.constant 0 : index
    %c0_18 = arith.constant 0 : index
    %21 = vector.load %arg7[%c0_16, %c0_17, %c0_18] : memref<1x8x1xf32, #tpu.memory_space<vmem>>, vector<1x8x1xf32>
    %22 = vector.shape_cast %21 : vector<1x8x1xf32> to vector<8x1xf32>
    %23 = vector.shape_cast %20 : vector<8x1xf32> to vector<1x8x1xf32>
    tpu.vector_store %arg7[%c0_16, %c0_17, %c0_18], %23 {strides = array<i32>} : memref<1x8x1xf32, #tpu.memory_space<vmem>>, vector<1x8x1xf32>,
    %c0_19 = arith.constant 0 : index
    %c0_20 = arith.constant 0 : index
    %24 = vector.load %arg4[%c0_19, %c0_20] : memref<8x1xf32, #tpu.memory_space<vmem>>, vector<8x1xf32>
    %25 = vector.broadcast %24 : vector<8x1xf32> to vector<8x128xf32>
    %26 = arith.addf %3, %25 : vector<8x128xf32>
    %27 = arith.truncf %26 : vector<8x128xf32> to vector<8x128xbf16>
    %c0_21 = arith.constant 0 : index
    %c0_22 = arith.constant 0 : index
    %c0_23 = arith.constant 0 : index
    %28 = vector.load %arg5[%c0_21, %c0_22, %c0_23] : memref<1x8x128xbf16, #tpu.memory_space<vmem>>, vector<1x8x128xbf16>
    %29 = vector.shape_cast %28 : vector<1x8x128xbf16> to vector<8x128xbf16>
    %30 = vector.shape_cast %27 : vector<8x128xbf16> to vector<1x8x128xbf16>
    tpu.vector_store %arg5[%c0_21, %c0_22, %c0_23], %30 {strides = array<i32>} : memref<1x8x128xbf16, #tpu.memory_space<vmem>>, vector<1x8x128xbf16>,
    return
  }
  func.func @transform_0(%arg0: i32, %arg1: i32) -> (i32, i32, i32) {
    %c0_i32 = arith.constant 0 : i32
    %c0_i32_0 = arith.constant 0 : i32
    return %arg0, %c0_i32, %arg1 : i32, i32, i32
  }
  func.func @transform_1(%arg0: i32, %arg1: i32) -> (i32, i32) {
    %c0_i32 = arith.constant 0 : i32
    %c0_i32_0 = arith.constant 0 : i32
    %c0_i32_1 = arith.constant 0 : i32
    return %c0_i32, %c0_i32_0 : i32, i32
  }
  func.func @transform_2(%arg0: i32, %arg1: i32) -> (i32, i32) {
    %c0_i32 = arith.constant 0 : i32
    %c0_i32_0 = arith.constant 0 : i32
    %c0_i32_1 = arith.constant 0 : i32
    return %c0_i32, %c0_i32_0 : i32, i32
  }
  func.func @transform_3(%arg0: i32, %arg1: i32) -> (i32, i32, i32) {
    %c0_i32 = arith.constant 0 : i32
    %c0_i32_0 = arith.constant 0 : i32
    return %arg0, %c0_i32, %arg1 : i32, i32, i32
  }
  func.func @transform_4(%arg0: i32, %arg1: i32) -> (i32, i32, i32) {
    %c0_i32 = arith.constant 0 : i32
    %c0_i32_0 = arith.constant 0 : i32
    %c0_i32_1 = arith.constant 0 : i32
    return %arg0, %c0_i32, %c0_i32_0 : i32, i32, i32
  }
  func.func @transform_5(%arg0: i32, %arg1: i32) -> (i32, i32, i32) {
    %c0_i32 = arith.constant 0 : i32
    %c0_i32_0 = arith.constant 0 : i32
    %c0_i32_1 = arith.constant 0 : i32
    return %arg0, %c0_i32, %c0_i32_0 : i32, i32, i32
  }
}

</mosaic_0001>

<bundles_post_ra>
// kernel: tpu_custom_call.1
= control target key start
LH: loop header
LB: loop body
LE: loop exit
PB: predicated region body
PF: predicated region fallthrough
CT: control target
= control target key end

     0   :  { %11 = vsyncpa [#allocation3], 0  ;;  %s811_s0 = inlined_call_operand.vmem [shape: bf16[2,36,128], index: 0, kind: input, shape index: {}]   ;;  %s812_s1 = inlined_call_operand.vmem [shape: bf16[8,36], index: 1, kind: input, shape index: {}]   ;;  %s813_s2 = inlined_call_operand.vmem [shape: f32[8,1], index: 2, kind: input, shape index: {}]   ;;  %s814_s3 = inlined_call_operand.hbm [shape: bf16[2,8,128], index: 3, kind: output, shape index: {0}]   ;;  %s815_s4 = inlined_call_operand.vmem [shape: f32[2,8,1], index: 4, kind: output, shape index: {1}]   ;;  %s816_s5 = inlined_call_operand.vmem [shape: f32[2,8,1], index: 5, kind: output, shape index: {2}]  }
   0x1   :  { %13 = vsyncpa [#allocation3 + $0x1], 0  ;;  %s688_s18 = smov 0   ;;  %s690_s19 = smov 0  }
   0x2   :  { %s692_s20 = smov 0   ;;  %s694_s21 = smov 0  }
   0x3   :  { %s696_s22 = smov 0   ;;  %s698_s23 = smov 0  }
   0x4 LB: > { %s493_s24 = sadd.s32 4294967295, %s654_s23   ;;  %s494_s25 = sadd.s32 4294967294, %s654_s23   ;;  %s654_s23 = sphi %s698_s23, %s19_s23   ;;  %s650_s22 = sphi %s696_s22, %s823_s22   ;;  %s646_s21 = sphi %s694_s21, %s822_s21   ;;  %s642_s20 = sphi %s692_s20, %s821_s20   ;;  %s638_s19 = sphi %s690_s19, %s820_s19   ;;  %s634_s18 = sphi %s688_s18, %s819_s18  }
   0x5   : > { %s31_s26 = sadd.s32 1, %s650_s22  ;;  %s110_s27 = sadd.s32 1, %s642_s20 }
   0x6   : > { %p33_p0 = scmp.ge.s32.totalorder %s31_s26, 2  ;;  %p120_p1 = scmp.ne.s32.totalorder %s642_s20, %s638_s19 }
   0x7   : > { %p121_p2 = scmp.eq.s32.totalorder %s493_s24, 1  ;;  %p126_p3 = scmp.ne.s32.totalorder %s638_s19, %s634_s18 }
   0x8   : > { %s825_s26 = smov (%p33_p0, %s31_s26), 0  ;;  %p127_p5 = scmp.eq.s32.totalorder %s494_s25, 1 }
   0x9   : > { %p728_p4 = por %p121_p2, %p120_p1  ;;  %s105_s29 = ssub.s32 %s650_s22, %s825_s26 }
   0xa   : > { %p497_p6 = scmp.ge.s32.totalorder %s654_s23, 1  ;;  %p108_p7 = scmp.eq.s32.totalorder %s105_s29, 0 }
   0xb   : > { %p735_p8 = por %p127_p5, %p126_p3  ;;  %p214_p9 = scmp.lt.s32.totalorder %s654_s23, 3 }
   0xc   : > { %s741_s6 = scalar_select %p108_p7, %s642_s20, %s110_s27  }
   0xd   : > { %p215_p10 = pnand %p497_p6, %p214_p9 }
   0xe   : > { %p253_p11 = scmp.lt.s32.totalorder (!%p215_p10), %s646_s21, 1  ;;  %s238_s8 = sand.u32 (!%p215_p10), 1, %s638_s19  }
   0xf   : > { %218 = sbr.rel (%p215_p10) target bundleno = 289 (0x121), region = 32 }
  0x14   : > { %v656_v0 = vmov 0   ;;  %v331_v1 = vld [vmem:[%s813_s2] sm:$0xff]  ;;  %s254_s9 = scalar_select %p253_p11, %s646_s21, 1  ;;  %vm295_vm0 = vcmask 1041408   ;;  %vm291_vm1 = vcmask 293888   ;;  %vm316_vm2 = vcmask 7168  }
  0x15   : > { %575 = vset.pattern.permute.xlu0 %v656_v0  ;;  %v270_v8 = vld [vmem:[%s812_s1] sm:$0xf]  ;;  %v657_v9 = vmov 0.0  }
  0x16   : > { %334 = vperm.xlu0 %575, %v331_v1   ;;  %s517_s10 = smul.u32 20, %s254_s9  ;;  %s500_s16 = sshll.u32 %s254_s9, 3 }
  0x17   : > { %s757_s25 = scalar_lea.vmem %s815_s4, %s500_s16  ;;  %s764_s7 = scalar_lea.vmem %s816_s5, %s500_s16 }
  0x18   : > { %s260_s13 = scalar_lea.vmem %s811_s0, %s517_s10  ;;  %317 = vst.msk [vmem:[%s757_s25] sm:$0xff] %vm316_vm2, %v657_v9  ;;  %s512_s9 = sshll.u32 %s646_s21, 2 }
  0x19   : > { %v275_v2 = vld [vmem:[%s260_s13 + $0x10] sm:$0x3]  ;;  %v516_v6 = vld [vmem:[%s260_s13 + $0x8] sm:$0xff]  ;;  %v515_v7 = vld [vmem:[%s260_s13] sm:$0xff]  ;;  %318 = vst.msk [vmem:[%s764_s7] sm:$0xff] %vm316_vm2, %v657_v9  ;;  %s498_s10 = sshll.u32 %s238_s8, 2  ;;  %s360_s13 = scalar_lea.hbm %s814_s3, %s512_s9 }
  0x1a   : > { %v285_v3 = vunpack.c.l.b16 %v275_v2  ;;  %s240_s14 = scalar_lea.vmem [#allocation2], %s498_s10  ;;  %s364_s17 = sshll.u32 %s360_s13, 4  ;;  %s365_s17 = int_to_ptr.hbm [resolvable:$true] %s364_s17 }
  0x1b   : > { %s362_s15 = sshll.u32 %s240_s14, 4  ;;  %s341_s21 = scalar_lea.sflag [#allocation3], %s238_s8  ;;  %s363_s15 = int_to_ptr.vmem [resolvable:$true] %s362_s15 }
  0x1c   : > { %v288_v4 = vpack.c.b16 %v285_v3, %v285_v3  ;;  %s590_s16 = sshra.s32 %s365_s17, 4  ;;  %s596_s9 = scalar_lea.hbm %s814_s3, 8  ;;  %s591_s16 = int_to_ptr.hbm [resolvable:$true] %s590_s16 }
  0x1d   : > { %s592_s24 = scalar_lea.hbm %s591_s16, 4  ;;  %p597_p1 = scmp.lt.s32.totalorder %s591_s16, %s814_s3 }
  0x1e   : > { %v297_v5 = vsel %vm295_vm0, %v288_v4, 0  ;;  %p593_p12 = scmp.ne.s32.totalorder %s591_s16, %s592_s24  ;;  %p598_p2 = scmp.lt.s32.totalorder %s596_s9, %s592_s24 }
  0x1f   : > { %304 = vmatpush.bf16.msra.mxu0 %v297_v5 }
  0x20   : > { %p594_p13 = pnand %p593_p12, %p728_p4  ;;  %p599_p3 = por %p598_p2, %p597_p1 }
  0x22   : > { %p595_p0 = pneg %p594_p13 }
  0x23   : > { %305 = vmatpush.bf16.msra.mxu0 %v516_v6 }
  0x24   : > { %p600_p5 = pnand %p599_p3, %p595_p0 }
  0x27   : > { %306 = vmatpush.bf16.msra.mxu0 %v515_v7 }
  0x2a   : > { %510 = vmatmul.msk.bf16.vlgmr.msra.gmra.mxu0 %vm291_vm1, %v270_v8 }
  0x88   : > { %v335_v10 = vpop.permute.xlu0 %334 }
  0xa7   : > { %v308_v11 = vpop.f32.mrf.mxu0 }
  0xa8   : > { %v337_v12 = vadd.f32 %v335_v10, %v308_v11  ;;  %320 = vadd.xlane.f32.xlu0 %v308_v11  ;;  %v326_v13 = vmul.f32 %v308_v11, %v308_v11 }
  0xaa   : > { %v338_v14 = vpack.c.bf16 %v337_v12, %v337_v12  ;;  %327 = vadd.xlane.f32.xlu1 %v326_v13 }
  0xac   : > { %339 = vst [vmem:[%s240_s14] sm:$0xf] %v338_v14 }
  0xad   : > { %603 = shalt.err (!%p600_p5)
}
  0xae   : > { %518 = dma.vmem_to_hbm [thread:$0]  (%p728_p4), %s363_s15, 64, %s365_s17, %s341_s21   ;;  %v319_v16 = vld [vmem:[%s757_s25] sm:$0xff] }
  0xaf   : > { %v310_v15 = vpop.f32.mrf.mxu0  ;;  %v325_v18 = vld [vmem:[%s764_s7] sm:$0xff] }
 0x11b   : > { %v321_v17 = vpop.xlane.xlu0 %320 }
 0x11c   : > { %v322_v19 = vadd.f32 %v321_v17, %v319_v16 }
 0x11d   : > { %v328_v20 = vpop.xlane.xlu1 %327 }
 0x11e   : > { %324 = vst.msk [vmem:[%s757_s25] sm:$0xff] %vm316_vm2, %v322_v19  ;;  %v329_v21 = vadd.f32 %v328_v20, %v325_v18 }
 0x120   : > { %330 = vst.msk [vmem:[%s764_s7] sm:$0xff] %vm316_vm2, %v329_v21 }
 0x121 PF: > { %p524_p6 = scmp.ge.s32.totalorder %s654_s23, 2  ;;  %s382_s28 = sand.u32 1, %s634_s18  }
 0x122   : > { %s383_s8 = scalar_lea.sflag [#allocation3], %s382_s28 }
 0x123   : > { %p521_p7 = pnand %p524_p6, %p735_p8 }
 0x125   : > { %p522_p4 = pneg %p521_p7 }
 0x127   : > { %629 = dma.done.wait (%p522_p4), %s383_s8, 64  }
 0x128   : > { %631 = vsyncadd (%p522_p4), %s383_s8, 4294967232  ;;  %s19_s23 = sadd.s32 1, %s654_s23   ;;  %s819_s18 = smov %s638_s19 }
 0x129   : > { %p16_p9 = scmp.ge.s32.totalorder %s19_s23, 4   ;;  %s820_s19 = smov %s642_s20 }
 0x12a   : > { %s821_s20 = smov %s741_s6  ;;  %s822_s21 = smov %s650_s22 }
 0x12b   : > { %s823_s22 = smov %s825_s26  ;;  %18 = sbr.rel (!%p16_p9) target bundleno = 4 (0x4), region = 95 }
 0x130   :  { %403 = vsyncpa [#allocation3], 1 }
 0x131   :  { %405 = vsyncpa [#allocation3 + $0x1], 1 }

// kernel: tpu_custom_call.1
= control target key start
LH: loop header
LB: loop body
LE: loop exit
PB: predicated region body
PF: predicated region fallthrough
CT: control target
= control target key end

     0   :  { %11 = vsyncpa [#allocation3], 0  ;;  %s811_s0 = inlined_call_operand.vmem [shape: bf16[2,36,128], index: 0, kind: input, shape index: {}]   ;;  %s812_s1 = inlined_call_operand.vmem [shape: bf16[8,36], index: 1, kind: input, shape index: {}]   ;;  %s813_s2 = inlined_call_operand.vmem [shape: f32[8,1], index: 2, kind: input, shape index: {}]   ;;  %s814_s3 = inlined_call_operand.hbm [shape: bf16[2,8,128], index: 3, kind: output, shape index: {0}]   ;;  %s815_s4 = inlined_call_operand.vmem [shape: f32[2,8,1], index: 4, kind: output, shape index: {1}]   ;;  %s816_s5 = inlined_call_operand.vmem [shape: f32[2,8,1], index: 5, kind: output, shape index: {2}]  }
   0x1   :  { %13 = vsyncpa [#allocation3 + $0x1], 0  ;;  %s688_s18 = smov 0   ;;  %s690_s19 = smov 0  }
   0x2   :  { %s692_s20 = smov 0   ;;  %s694_s21 = smov 0  }
   0x3   :  { %s696_s22 = smov 0   ;;  %s698_s23 = smov 0  }
   0x4 LB: > { %s493_s24 = sadd.s32 4294967295, %s654_s23   ;;  %s494_s25 = sadd.s32 4294967294, %s654_s23   ;;  %s654_s23 = sphi %s698_s23, %s19_s23   ;;  %s650_s22 = sphi %s696_s22, %s823_s22   ;;  %s646_s21 = sphi %s694_s21, %s822_s21   ;;  %s642_s20 = sphi %s692_s20, %s821_s20   ;;  %s638_s19 = sphi %s690_s19, %s820_s19   ;;  %s634_s18 = sphi %s688_s18, %s819_s18  }
   0x5   : > { %s31_s26 = sadd.s32 1, %s650_s22  ;;  %s110_s27 = sadd.s32 1, %s642_s20 }
   0x6   : > { %p33_p0 = scmp.ge.s32.totalorder %s31_s26, 2  ;;  %p120_p1 = scmp.ne.s32.totalorder %s642_s20, %s638_s19 }
   0x7   : > { %p121_p2 = scmp.eq.s32.totalorder %s493_s24, 1  ;;  %p126_p3 = scmp.ne.s32.totalorder %s638_s19, %s634_s18 }
   0x8   : > { %s825_s26 = smov (%p33_p0, %s31_s26), 0  ;;  %p127_p5 = scmp.eq.s32.totalorder %s494_s25, 1 }
   0x9   : > { %p728_p4 = por %p121_p2, %p120_p1  ;;  %s105_s29 = ssub.s32 %s650_s22, %s825_s26 }
   0xa   : > { %p497_p6 = scmp.ge.s32.totalorder %s654_s23, 1  ;;  %p108_p7 = scmp.eq.s32.totalorder %s105_s29, 0 }
   0xb   : > { %p735_p8 = por %p127_p5, %p126_p3  ;;  %p214_p9 = scmp.lt.s32.totalorder %s654_s23, 3 }
   0xc   : > { %s741_s6 = scalar_select %p108_p7, %s642_s20, %s110_s27  }
   0xd   : > { %p215_p10 = pnand %p497_p6, %p214_p9 }
   0xe   : > { %p253_p11 = scmp.lt.s32.totalorder (!%p215_p10), %s646_s21, 1  ;;  %s238_s8 = sand.u32 (!%p215_p10), 1, %s638_s19  }
   0xf   : > { %218 = sbr.rel (%p215_p10) target bundleno = 289 (0x121), region = 32 }
  0x14   : > { %v656_v0 = vmov 0   ;;  %v331_v1 = vld [vmem:[%s813_s2] sm:$0xff]  ;;  %s254_s9 = scalar_select %p253_p11, %s646_s21, 1  ;;  %vm295_vm0 = vcmask 1041408   ;;  %vm291_vm1 = vcmask 293888   ;;  %vm316_vm2 = vcmask 7168  }
  0x15   : > { %575 = vset.pattern.permute.xlu0 %v656_v0  ;;  %v270_v8 = vld [vmem:[%s812_s1] sm:$0xf]  ;;  %v657_v9 = vmov 0.0  }
  0x16   : > { %334 = vperm.xlu0 %575, %v331_v1   ;;  %s517_s10 = smul.u32 20, %s254_s9  ;;  %s500_s16 = sshll.u32 %s254_s9, 3 }
  0x17   : > { %s757_s25 = scalar_lea.vmem %s815_s4, %s500_s16  ;;  %s764_s7 = scalar_lea.vmem %s816_s5, %s500_s16 }
  0x18   : > { %s260_s13 = scalar_lea.vmem %s811_s0, %s517_s10  ;;  %317 = vst.msk [vmem:[%s757_s25] sm:$0xff] %vm316_vm2, %v657_v9  ;;  %s512_s9 = sshll.u32 %s646_s21, 2 }
  0x19   : > { %v275_v2 = vld [vmem:[%s260_s13 + $0x10] sm:$0x3]  ;;  %v516_v6 = vld [vmem:[%s260_s13 + $0x8] sm:$0xff]  ;;  %v515_v7 = vld [vmem:[%s260_s13] sm:$0xff]  ;;  %318 = vst.msk [vmem:[%s764_s7] sm:$0xff] %vm316_vm2, %v657_v9  ;;  %s498_s10 = sshll.u32 %s238_s8, 2  ;;  %s360_s13 = scalar_lea.hbm %s814_s3, %s512_s9 }
  0x1a   : > { %v285_v3 = vunpack.c.l.b16 %v275_v2  ;;  %s240_s14 = scalar_lea.vmem [#allocation2], %s498_s10  ;;  %s364_s17 = sshll.u32 %s360_s13, 4  ;;  %s365_s17 = int_to_ptr.hbm [resolvable:$true] %s364_s17 }
  0x1b   : > { %s362_s15 = sshll.u32 %s240_s14, 4  ;;  %s341_s21 = scalar_lea.sflag [#allocation3], %s238_s8  ;;  %s363_s15 = int_to_ptr.vmem [resolvable:$true] %s362_s15 }
  0x1c   : > { %v288_v4 = vpack.c.b16 %v285_v3, %v285_v3  ;;  %s590_s16 = sshra.s32 %s365_s17, 4  ;;  %s596_s9 = scalar_lea.hbm %s814_s3, 8  ;;  %s591_s16 = int_to_ptr.hbm [resolvable:$true] %s590_s16 }
  0x1d   : > { %s592_s24 = scalar_lea.hbm %s591_s16, 4  ;;  %p597_p1 = scmp.lt.s32.totalorder %s591_s16, %s814_s3 }
  0x1e   : > { %v297_v5 = vsel %vm295_vm0, %v288_v4, 0  ;;  %p593_p12 = scmp.ne.s32.totalorder %s591_s16, %s592_s24  ;;  %p598_p2 = scmp.lt.s32.totalorder %s596_s9, %s592_s24 }
  0x1f   : > { %304 = vmatpush.bf16.msra.mxu0 %v297_v5 }
  0x20   : > { %p594_p13 = pnand %p593_p12, %p728_p4  ;;  %p599_p3 = por %p598_p2, %p597_p1 }
  0x22   : > { %p595_p0 = pneg %p594_p13 }
  0x23   : > { %305 = vmatpush.bf16.msra.mxu0 %v516_v6 }
  0x24   : > { %p600_p5 = pnand %p599_p3, %p595_p0 }
  0x27   : > { %306 = vmatpush.bf16.msra.mxu0 %v515_v7 }
  0x2a   : > { %510 = vmatmul.msk.bf16.vlgmr.msra.gmra.mxu0 %vm291_vm1, %v270_v8 }
  0x88   : > { %v335_v10 = vpop.permute.xlu0 %334 }
  0xa7   : > { %v308_v11 = vpop.f32.mrf.mxu0 }
  0xa8   : > { %v337_v12 = vadd.f32 %v335_v10, %v308_v11  ;;  %320 = vadd.xlane.f32.xlu0 %v308_v11  ;;  %v326_v13 = vmul.f32 %v308_v11, %v308_v11 }
  0xaa   : > { %v338_v14 = vpack.c.bf16 %v337_v12, %v337_v12  ;;  %327 = vadd.xlane.f32.xlu1 %v326_v13 }
  0xac   : > { %339 = vst [vmem:[%s240_s14] sm:$0xf] %v338_v14 }
  0xad   : > { %603 = shalt.err (!%p600_p5)
}
  0xae   : > { %518 = dma.vmem_to_hbm [thread:$0]  (%p728_p4), %s363_s15, 64, %s365_s17, %s341_s21   ;;  %v319_v16 = vld [vmem:[%s757_s25] sm:$0xff] }
  0xaf   : > { %v310_v15 = vpop.f32.mrf.mxu0  ;;  %v325_v18 = vld [vmem:[%s764_s7] sm:$0xff] }
 0x11b   : > { %v321_v17 = vpop.xlane.xlu0 %320 }
 0x11c   : > { %v322_v19 = vadd.f32 %v321_v17, %v319_v16 }
 0x11d   : > { %v328_v20 = vpop.xlane.xlu1 %327 }
 0x11e   : > { %324 = vst.msk [vmem:[%s757_s25] sm:$0xff] %vm316_vm2, %v322_v19  ;;  %v329_v21 = vadd.f32 %v328_v20, %v325_v18 }
 0x120   : > { %330 = vst.msk [vmem:[%s764_s7] sm:$0xff] %vm316_vm2, %v329_v21 }
 0x121 PF: > { %p524_p6 = scmp.ge.s32.totalorder %s654_s23, 2  ;;  %s382_s28 = sand.u32 1, %s634_s18  }
 0x122   : > { %s383_s8 = scalar_lea.sflag [#allocation3], %s382_s28 }
 0x123   : > { %p521_p7 = pnand %p524_p6, %p735_p8 }
 0x125   : > { %p522_p4 = pneg %p521_p7 }
 0x127   : > { %629 = dma.done.wait (%p522_p4), %s383_s8, 64  }
 0x128   : > { %631 = vsyncadd (%p522_p4), %s383_s8, 4294967232  ;;  %s19_s23 = sadd.s32 1, %s654_s23   ;;  %s819_s18 = smov %s638_s19 }
 0x129   : > { %p16_p9 = scmp.ge.s32.totalorder %s19_s23, 4   ;;  %s820_s19 = smov %s642_s20 }
 0x12a   : > { %s821_s20 = smov %s741_s6  ;;  %s822_s21 = smov %s650_s22 }
 0x12b   : > { %s823_s22 = smov %s825_s26  ;;  %18 = sbr.rel (!%p16_p9) target bundleno = 4 (0x4), region = 95 }
 0x130   :  { %403 = vsyncpa [#allocation3], 1 }
 0x131   :  { %405 = vsyncpa [#allocation3 + $0x1], 1 }

</bundles_post_ra>
